<compile_context>
chip_gen: v5e
topology: v5e:2x2
jax: 0.10.0
libtpu: 0.0.40
codegen_flags: <defaults>
</compile_context>

<pallas_src>
import math
from functools import partial

import jax
import jax.numpy as jnp
import numpy as np
from jax import lax
from jax.experimental import pallas as pl
from jax.experimental.pallas import tpu as pltpu

_LANE = 128
_G = 8          # rows per gathered block (== vreg sublane count)
_G_SHIFT = 3    # log2(_G)


def _round_up(x: int, m: int) -> int:
    return ((x + m - 1) // m) * m


def _resample_kernel(starts_ref, band_ref, out_ref, *, ratio, orig_len, batch):
    # starts_ref : SMEM (num_tiles,) int32   -- absolute source offset of the band
    # band_ref   : VMEM (2*B*G, Q) f32       -- de-interleaved band; rows ordered
    #                                           (b, half, r): half 0 = wav[start+q*G+r],
    #                                           half 1 = wav[start+q*G+r+1]
    # out_ref    : VMEM (B, tile_n) f32
    j = pl.program_id(0)
    start = starts_ref[j]                               # scalar int32 from SMEM
    q_blocks = band_ref.shape[1]
    tile_n = out_ref.shape[1]

    # Per-output-column source index / weight, same float32 math as reference:
    # idx = n * (input_rate / output_rate); low = trunc(idx); frac = fmod(idx, 1).
    col = lax.broadcasted_iota(jnp.int32, (1, tile_n), 1)
    n_abs = col + j * tile_n
    idx = n_abs.astype(jnp.float32) * ratio
    low = idx.astype(jnp.int32)                         # trunc == floor (idx >= 0)
    frac = idx - low.astype(jnp.float32)                # == fmod(idx, 1.0)

    # high = min(low + 1, T - 1): when clamped, both taps hit the same sample;
    # fold that into the low weight so the +1-shifted band is never consulted.
    clamped = low >= (orig_len - 1)
    w_low = jnp.where(clamped, 1.0, 1.0 - frac)         # (1, tile_n)
    w_high = jnp.where(clamped, 0.0, frac)

    low_rel = low - start                                # band-relative, >= 0
    blk = jnp.right_shift(low_rel, _G_SHIFT)             # low_rel // 8
    sub = jnp.bitwise_and(low_rel, _G - 1)               # low_rel % 8

    # One-hot over 8-row blocks only -> MXU gathers, per output column, the whole
    # block containing its low tap (and the same block of the shifted signal).
    q_iota = lax.broadcasted_iota(jnp.int32, (q_blocks, tile_n), 0)
    m = (q_iota == blk).astype(jnp.float32)              # (Q, tile_n)
    gathered = jnp.dot(band_ref[...], m,
                       preferred_element_type=jnp.float32)   # (2*B*G, tile_n)

    # Row-within-block selection on the VPU (only 8 rows -> cheap).
    r_iota = lax.broadcasted_iota(jnp.int32, (_G, tile_n), 0)
    sel = r_iota == sub                                   # (G, tile_n) bool

    rows = []
    for b in range(batch):                                # unrolled, B is small
        base = b * 2 * _G                                 # 8-aligned static slices
        g_lo = gathered[base:base + _G, :]                # (G, tile_n)
        g_hi = gathered[base + _G:base + 2 * _G, :]
        tap_lo = jnp.sum(jnp.where(sel, g_lo, 0.0), axis=0, keepdims=True)
        tap_hi = jnp.sum(jnp.where(sel, g_hi, 0.0), axis=0, keepdims=True)
        rows.append(tap_lo * w_low + tap_hi * w_high)     # (1, tile_n)

    out_ref[...] = jnp.concatenate(rows, axis=0).astype(out_ref.dtype)


def change_sample_rate(wav, input_rate: int, output_rate: int, *, max_tile_n: int = 512):
    """Pallas equivalent of ChangeSampleRate.forward."""
    B = wav.shape[0]
    wav = wav.reshape(B, -1).astype(jnp.float32)
    T = wav.shape[1]
    N = T * output_rate // input_rate
    ratio = input_rate / output_rate
    if N <= 0:
        return jnp.zeros((B, 0), jnp.float32)

    # ---- output tiling: lane-dense, 128-aligned tiles ------------------------
    tile_n = min(max_tile_n, _round_up(N, _LANE))
    num_tiles = (N + tile_n - 1) // tile_n
    n_pad = num_tiles * tile_n

    # ---- source band per tile (banded operator, 2 taps/column) ---------------
    band_need = int(math.ceil((tile_n - 1) * ratio)) + 8   # + margin for fp32 slop
    tile_t = max(_LANE, _round_up(band_need, _LANE))
    q_blocks = tile_t // _G

    n0 = np.arange(num_tiles, dtype=np.int64) * tile_n
    starts = np.maximum(0, (n0 * input_rate) // output_rate - 2).astype(np.int32)

    t_pad = max(T, int(starts.max()) + tile_t + 1)          # +1 for the shifted copy
    wav_p = jnp.pad(wav, ((0, 0), (0, t_pad - T)))

    # Wrapper-side de-interleave (layout plumbing): band row r, col q holds
    # wav[start + q*8 + r]; second half holds the +1-shifted signal (high tap).
    gidx = (starts[:, None, None]
            + np.arange(_G, dtype=np.int32)[None, :, None]
            + (np.arange(q_blocks, dtype=np.int32) * _G)[None, None, :])  # (nt, G, Q)
    band_pair = jnp.stack([wav_p[:, gidx], wav_p[:, gidx + 1]], axis=2)   # (B, nt, 2, G, Q)
    bands = jnp.transpose(band_pair, (1, 0, 2, 3, 4)).reshape(
        num_tiles, 2 * B * _G, q_blocks)                                  # rows = (b, half, r)

    kernel = partial(_resample_kernel, ratio=ratio, orig_len=T, batch=B)

    out_pad = pl.pallas_call(
        kernel,
        out_shape=jax.ShapeDtypeStruct((B, n_pad), jnp.float32),
        grid_spec=pltpu.PrefetchScalarGridSpec(
            num_scalar_prefetch=1,
            grid=(num_tiles,),
            in_specs=[pl.BlockSpec((None, 2 * B * _G, q_blocks),
                                   lambda j, s: (j, 0, 0))],
            out_specs=pl.BlockSpec((B, tile_n), lambda j, s: (0, j)),
        ),
        compiler_params=pltpu.CompilerParams(dimension_semantics=("parallel",)),
    )(jnp.asarray(starts), bands)

    return out_pad[:, :N]


def _reference(wav, input_rate: int, output_rate: int):
    # Pure-JAX reference matching the PyTorch module semantics.
    B = wav.shape[0]
    wav = wav.reshape(B, -1).astype(jnp.float32)
    T = wav.shape[1]
    N = T * output_rate // input_rate
    idx = jnp.arange(N, dtype=jnp.float32) * (input_rate / output_rate)
    low = idx.astype(jnp.int32)
    high = jnp.minimum(low + 1, T - 1)
    frac = jnp.mod(idx, 1.0)
    return wav[:, low] * (1.0 - frac)[None, :] + wav[:, high] * frac[None, :]


if __name__ == "__main__":
    key = jax.random.PRNGKey(0)
    B, T = 2, 800
    input_rate, output_rate = 22050, 16000   # -> N = 800 * 16000 // 22050 = 580
    wav = jax.random.normal(key, (B, T), dtype=jnp.float32)

    out = change_sample_rate(wav, input_rate, output_rate)
    out = jax.block_until_ready(out)

    ref = _reference(wav, input_rate, output_rate)
    assert out.shape == ref.shape, (out.shape, ref.shape)
    assert jnp.allclose(out, ref, atol=1e-5, rtol=1e-5), "mismatch vs reference"

    print("KERNEL_OK")
</pallas_src>

<mosaic_0001>
module attributes {stable_mosaic.version = 11 : i64} {
  func.func @_resample_kernel(%arg0: i32, %arg1: memref<2xi32, #tpu.memory_space<smem>>, %arg2: memref<1x32x96xf32, #tpu.memory_space<vmem>>, %arg3: memref<2x512xf32, #tpu.memory_space<vmem>>) attributes {dimension_semantics = [#tpu.dimension_semantics<parallel>], iteration_bounds = array<i64: 2>, scalar_prefetch = 1 : i64, scratch_operands = 0 : i64, tpu.core_type = #tpu.core_type<tc>, window_params = [{transform_indices = @transform_0, window_bounds = array<i64: 1, 32, 96>}, {transform_indices = @transform_1, window_bounds = array<i64: 2, 512>}]} {
    %0 = arith.index_cast %arg0 : i32 to index
    %1 = memref.load %arg1[%0] : memref<2xi32, #tpu.memory_space<smem>>
    %2 = tpu.iota {dimensions = array<i32: 1>} : vector<1x512xi32>
    %c512_i32 = arith.constant 512 : i32
    %3 = arith.muli %arg0, %c512_i32 : i32
    %4 = vector.broadcast %3 : i32 to vector<1x512xi32>
    %5 = arith.addi %2, %4 : vector<1x512xi32>
    %6 = arith.sitofp %5 : vector<1x512xi32> to vector<1x512xf32>
    %cst = arith.constant 1.37812495 : f32
    %7 = vector.broadcast %cst : f32 to vector<1x512xf32>
    %8 = arith.mulf %6, %7 : vector<1x512xf32>
    %9 = arith.fptosi %8 : vector<1x512xf32> to vector<1x512xi32>
    %10 = arith.sitofp %9 : vector<1x512xi32> to vector<1x512xf32>
    %11 = arith.subf %8, %10 : vector<1x512xf32>
    %c799_i32 = arith.constant 799 : i32
    %12 = vector.broadcast %c799_i32 : i32 to vector<1x512xi32>
    %13 = arith.cmpi sge, %9, %12 : vector<1x512xi32>
    %cst_0 = arith.constant 1.000000e+00 : f32
    %14 = vector.broadcast %cst_0 : f32 to vector<1x512xf32>
    %15 = arith.subf %14, %11 : vector<1x512xf32>
    %cst_1 = arith.constant 1.000000e+00 : f32
    %16 = vector.broadcast %cst_1 : f32 to vector<1x512xf32>
    %17 = arith.select %13, %16, %15 : vector<1x512xi1>, vector<1x512xf32>
    %cst_2 = arith.constant 0.000000e+00 : f32
    %18 = vector.broadcast %cst_2 : f32 to vector<1x512xf32>
    %19 = arith.select %13, %18, %11 : vector<1x512xi1>, vector<1x512xf32>
    %20 = vector.broadcast %1 : i32 to vector<1x512xi32>
    %21 = arith.subi %9, %20 : vector<1x512xi32>
    %c3_i32 = arith.constant 3 : i32
    %22 = vector.broadcast %c3_i32 : i32 to vector<1x512xi32>
    %23 = arith.shrsi %21, %22 : vector<1x512xi32>
    %c7_i32 = arith.constant 7 : i32
    %24 = vector.broadcast %c7_i32 : i32 to vector<1x512xi32>
    %25 = arith.andi %21, %24 : vector<1x512xi32>
    %26 = tpu.iota {dimensions = array<i32: 0>} : vector<96x512xi32>
    %27 = vector.broadcast %23 : vector<1x512xi32> to vector<96x512xi32>
    %28 = arith.cmpi eq, %26, %27 : vector<96x512xi32>
    %29 = arith.extui %28 : vector<96x512xi1> to vector<96x512xi32>
    %30 = arith.sitofp %29 : vector<96x512xi32> to vector<96x512xf32>
    %c0 = arith.constant 0 : index
    %c0_3 = arith.constant 0 : index
    %c0_4 = arith.constant 0 : index
    %31 = vector.load %arg2[%c0, %c0_3, %c0_4] : memref<1x32x96xf32, #tpu.memory_space<vmem>>, vector<1x32x96xf32>
    %32 = vector.shape_cast %31 : vector<1x32x96xf32> to vector<32x96xf32>
    %cst_5 = arith.constant dense<0.000000e+00> : vector<32x512xf32>
    %33 = tpu.matmul %32, %30, %cst_5 {dimension_numbers = #tpu.dot_dimension_numbers<[1], [0], [0], [1], [0, 0, 1, 1], [], []>} : vector<32x96xf32>, vector<96x512xf32>, vector<32x512xf32> -> vector<32x512xf32>
    %34 = tpu.iota {dimensions = array<i32: 0>} : vector<8x512xi32>
    %35 = vector.broadcast %25 : vector<1x512xi32> to vector<8x512xi32>
    %36 = arith.cmpi eq, %34, %35 : vector<8x512xi32>
    %37 = vector.extract_strided_slice %33 {offsets = [0, 0], sizes = [8, 512], strides = [1, 1]} : vector<32x512xf32> to vector<8x512xf32>
    %38 = vector.extract_strided_slice %33 {offsets = [8, 0], sizes = [8, 512], strides = [1, 1]} : vector<32x512xf32> to vector<8x512xf32>
    %cst_6 = arith.constant 0.000000e+00 : f32
    %39 = vector.broadcast %cst_6 : f32 to vector<8x512xf32>
    %40 = arith.select %36, %37, %39 : vector<8x512xi1>, vector<8x512xf32>
    %cst_7 = arith.constant dense<0.000000e+00> : vector<512xf32>
    %41 = vector.multi_reduction <add>, %40, %cst_7 [0] : vector<8x512xf32> to vector<512xf32>
    %42 = vector.shape_cast %41 : vector<512xf32> to vector<1x512xf32>
    %cst_8 = arith.constant 0.000000e+00 : f32
    %43 = vector.broadcast %cst_8 : f32 to vector<8x512xf32>
    %44 = arith.select %36, %38, %43 : vector<8x512xi1>, vector<8x512xf32>
    %cst_9 = arith.constant dense<0.000000e+00> : vector<512xf32>
    %45 = vector.multi_reduction <add>, %44, %cst_9 [0] : vector<8x512xf32> to vector<512xf32>
    %46 = vector.shape_cast %45 : vector<512xf32> to vector<1x512xf32>
    %47 = arith.mulf %42, %17 : vector<1x512xf32>
    %48 = arith.mulf %46, %19 : vector<1x512xf32>
    %49 = arith.addf %47, %48 : vector<1x512xf32>
    %50 = vector.extract_strided_slice %33 {offsets = [16, 0], sizes = [8, 512], strides = [1, 1]} : vector<32x512xf32> to vector<8x512xf32>
    %51 = vector.extract_strided_slice %33 {offsets = [24, 0], sizes = [8, 512], strides = [1, 1]} : vector<32x512xf32> to vector<8x512xf32>
    %cst_10 = arith.constant 0.000000e+00 : f32
    %52 = vector.broadcast %cst_10 : f32 to vector<8x512xf32>
    %53 = arith.select %36, %50, %52 : vector<8x512xi1>, vector<8x512xf32>
    %cst_11 = arith.constant dense<0.000000e+00> : vector<512xf32>
    %54 = vector.multi_reduction <add>, %53, %cst_11 [0] : vector<8x512xf32> to vector<512xf32>
    %55 = vector.shape_cast %54 : vector<512xf32> to vector<1x512xf32>
    %cst_12 = arith.constant 0.000000e+00 : f32
    %56 = vector.broadcast %cst_12 : f32 to vector<8x512xf32>
    %57 = arith.select %36, %51, %56 : vector<8x512xi1>, vector<8x512xf32>
    %cst_13 = arith.constant dense<0.000000e+00> : vector<512xf32>
    %58 = vector.multi_reduction <add>, %57, %cst_13 [0] : vector<8x512xf32> to vector<512xf32>
    %59 = vector.shape_cast %58 : vector<512xf32> to vector<1x512xf32>
    %60 = arith.mulf %55, %17 : vector<1x512xf32>
    %61 = arith.mulf %59, %19 : vector<1x512xf32>
    %62 = arith.addf %60, %61 : vector<1x512xf32>
    %63 = tpu.concatenate %49, %62 in 0 : vector<1x512xf32>, vector<1x512xf32> -> vector<2x512xf32>
    %c0_14 = arith.constant 0 : index
    %c0_15 = arith.constant 0 : index
    %64 = vector.load %arg3[%c0_14, %c0_15] : memref<2x512xf32, #tpu.memory_space<vmem>>, vector<2x512xf32>
    tpu.vector_store %arg3[%c0_14, %c0_15], %63 {strides = array<i32>} : memref<2x512xf32, #tpu.memory_space<vmem>>, vector<2x512xf32>,
    return
  }
  func.func @transform_0(%arg0: i32, %arg1: memref<2xi32, #tpu.memory_space<smem>>) -> (i32, i32, i32) {
    %c0_i32 = arith.constant 0 : i32
    %c0_i32_0 = arith.constant 0 : i32
    %c0_i32_1 = arith.constant 0 : i32
    return %arg0, %c0_i32, %c0_i32_0 : i32, i32, i32
  }
  func.func @transform_1(%arg0: i32, %arg1: memref<2xi32, #tpu.memory_space<smem>>) -> (i32, i32) {
    %c0_i32 = arith.constant 0 : i32
    %c0_i32_0 = arith.constant 0 : i32
    return %c0_i32, %arg0 : i32, i32
  }
}

</mosaic_0001>

<bundles_post_ra>
// kernel: tpu_custom_call.1
= control target key start
LH: loop header
LB: loop body
LE: loop exit
PB: predicated region body
PF: predicated region fallthrough
CT: control target
= control target key end

     0   :  { %s1056_s12 = smov [#allocation3]   ;;  %s1520_s0 = inlined_call_operand.hbm [shape: s32[2], index: 0, kind: input, shape index: {}]   ;;  %s1521_s1 = inlined_call_operand.hbm [shape: f32[2,32,96], index: 1, kind: input, shape index: {}]   ;;  %s1522_s2 = inlined_call_operand.hbm [shape: f32[2,1024], index: 2, kind: output, shape index: {}]  }
   0x1   :  { %s8_s11 = sshll.u32 %s1520_s0, 4  ;;  %s9_s11 = int_to_ptr.hbm [resolvable:$true] %s8_s11 }
   0x2   :  { %11 = dma.hbm_to_smem %s9_s11, 16, %s1056_s12, [#allocation2] }
   0x3   :  { %1030 = dma.done.wait [#allocation2], 16 }
   0x4   :  { %1031 = vsyncadd [#allocation2], 4294967280 }
   0x5   :  { %14 = sfence }
   0x6   :  { %15 = vsyncpa [#allocation5], 0 }
   0x7   :  { %17 = vsyncpa [#allocation5 + $0x1], 0 }
   0x8   :  { %18 = vsyncpa [#allocation6], 0 }
   0x9   :  { %20 = vsyncpa [#allocation6 + $0x1], 0  ;;  %s1078_s13 = smov 0   ;;  %s1080_s14 = smov 0  }
   0xa   :  { %s1082_s15 = smov 0   ;;  %s1084_s16 = smov 0  }
   0xb LB: > { %s1099_s0 = sadd.s32 4294967295, %s1054_s16   ;;  %s745_s17 = sadd.s32 4294967294, %s1054_s16   ;;  %s1054_s16 = sphi %s1084_s16, %s1540_s16   ;;  %s1050_s15 = sphi %s1082_s15, %s1539_s15   ;;  %s1046_s14 = sphi %s1080_s14, %s1538_s14   ;;  %s1042_s13 = sphi %s1078_s13, %s1537_s13  }
   0xc   : > { %s1103_s18 = sadd.s32 1, %s1054_s16   ;;  %s33_s19 = sadd.s32 1, %s1050_s15 }
   0xd   : > { %s30_s20 = ssub.s32 %s1054_s16, %s1103_s18  ;;  %p40_p0 = scmp.ne.s32.totalorder %s1050_s15, %s1046_s14 }
   0xe   : > { %p31_p1 = scmp.eq.s32.totalorder %s30_s20, 0  ;;  %p41_p2 = scmp.eq.s32.totalorder %s1054_s16, 0 }
   0xf   : > { %p46_p3 = scmp.ne.s32.totalorder %s1046_s14, %s1042_s13  ;;  %p47_p4 = scmp.eq.s32.totalorder %s1099_s0, 0 }
  0x10   : > { %s1115_s21 = scalar_select %p31_p1, %s1050_s15, %s33_s19  }
  0x11   : > { %p1117_p5 = por %p41_p2, %p40_p0  ;;  %p1121_p6 = por %p47_p4, %p46_p3 }
  0x12   : > { %p70_p7 = scmp.eq.s32.totalorder %s1099_s0, 1  ;;  %p76_p8 = scmp.eq.s32.totalorder %s745_s17, 1 }
  0x13   : > { %p906_p10 = scmp.lt.s32.totalorder %s1054_s16, 2  ;;  %s96_s26 = sand.u32 1, %s1050_s15  }
  0x14   : > { %p1128_p11 = por %p70_p7, %p40_p0  ;;  %p1132_p12 = por %p76_p8, %p46_p3 }
  0x15   : > { %s872_s27 = sshll.u32 %s1054_s16, 5  ;;  %s748_s28 = sshll.u32 %s96_s26, 5 }
  0x16   : > { %s105_s3 = scalar_lea.hbm %s1521_s1, %s872_s27  ;;  %s100_s5 = scalar_lea.vmem [#allocation4], %s748_s28 }
  0x17   : > { %s106_s4 = sshll.u32 %s105_s3, 4  ;;  %s108_s6 = sshll.u32 %s100_s5, 4  ;;  %s107_s4 = int_to_ptr.hbm [resolvable:$true] %s106_s4  ;;  %s109_s6 = int_to_ptr.vmem [resolvable:$true] %s108_s6 }
  0x18   : > { %p1143_p13 = pnand %p906_p10, %p1117_p5  ;;  %p751_p0 = scmp.ge.s32.totalorder %s1054_s16, 1 }
  0x19   : > { %p116_p1 = scmp.lt.s32.totalorder %s1054_s16, 3  ;;  %s97_s8 = scalar_lea.sflag [#allocation5], %s96_s26 }
  0x1a   : > { %s956_s9 = sshra.s32 %s107_s4, 4  ;;  %p960_p3 = pneg %p1143_p13  ;;  %s957_s9 = int_to_ptr.hbm [resolvable:$true] %s956_s9 }
  0x1b   : > { %s958_s10 = scalar_lea.hbm %s957_s9, 32  ;;  %s963_s17 = scalar_lea.hbm %s1521_s1, 64 }
  0x1c   : > { %p959_p2 = scmp.ne.s32.totalorder %s957_s9, %s958_s10  ;;  %p964_p5 = scmp.lt.s32.totalorder %s957_s9, %s1521_s1 }
  0x1d   : > { %p965_p8 = scmp.lt.s32.totalorder %s963_s17, %s958_s10 }
  0x1e   : > { %p961_p4 = pnand %p960_p3, %p959_p2 }
  0x1f   : > { %p966_p10 = por %p965_p8, %p964_p5 }
  0x20   : > { %p962_p7 = pneg %p961_p4 }
  0x22   : > { %p967_p9 = pnand %p966_p10, %p962_p7 }
  0x24   : > { %970 = shalt.err (!%p967_p9)
}
  0x25   : > { %s1057_s22 = smov 128   ;;  %s1058_s26 = smov 8  }
  0x26   : > { %901 = dma.hbm_to_vmem [thread:$0]  (!%p1143_p13), %s107_s4, 512, %s109_s6, %s97_s8, %s1057_s22, %s1057_s22, %s1058_s26  }
  0x27   : > { %p117_p2 = pnand %p751_p0, %p116_p1 }
  0x28   : > { %s1164_s27 = sand.u32 (!%p117_p2), 1, %s1046_s14  }
  0x29   : > { %120 = sbr.rel (%p117_p2) target bundleno = 275 (0x113), region = 24  ;;  %s752_s28 = sshll.u32 (!%p117_p2), %s1164_s27, 5 }
  0x2a   : > { %s123_s29 = scalar_lea.sflag (!%p117_p2), [#allocation5], %s1164_s27  ;;  %s1168_s30 = scalar_lea.vmem (!%p117_p2), [#allocation4], %s752_s28 }
  0x2e   : > { %1033 = dma.done.wait (%p1121_p6), %s123_s29, 512  }
  0x2f   : > { %1035 = vsyncadd (%p1121_p6), %s123_s29, 4294966784  ;;  %v148_v0 = vlaneseq  ;;  %s754_s3 = sshll.u32 %s1099_s0, 9  ;;  %s147_s4 = sld [smem:[#allocation3 + %s1099_s0]]  ;;  %v1059_v48 = vmov 1.0   ;;  %v365_v57 = vld [vmem:[%s1168_s30] sm:$0xff]  ;;  %v366_v61 = vld [vmem:[%s1168_s30 + $0x8] sm:$0xff] }
  0x30   : > { %v154_v1 = vstv %s754_s3  ;;  %v367_v62 = vld [vmem:[%s1168_s30 + $0x10] sm:$0xff]  ;;  %v368_v63 = vld [vmem:[%s1168_s30 + $0x18] sm:$0xff]  ;;  %s753_s23 = sshll.u32 %s1164_s27, 3  ;;  %s873_s5 = sshll.u32 %s1099_s0, 3 }
  0x31   : > { %v149_v2 = vand.u32 127, %v148_v0  ;;  %v1187_v21 = vshrl.u32 %v148_v0, 7  ;;  %s670_s8 = scalar_lea.hbm %s1522_s2, %s873_s5  ;;  %s145_s0 = scalar_lea.vmem [#allocation7], %s753_s23 }
  0x32   : > { %s672_s9 = sshll.u32 %s145_s0, 4  ;;  %s674_s10 = sshll.u32 %s670_s8, 4  ;;  %s673_s9 = int_to_ptr.vmem [resolvable:$true] %s672_s9  ;;  %s675_s10 = int_to_ptr.hbm [resolvable:$true] %s674_s10 }
  0x33   : > { %v150_v3 = vadd.s32 128, %v149_v2  ;;  %v151_v4 = vadd.s32 256, %v149_v2  ;;  %v152_v5 = vadd.s32 384, %v149_v2  ;;  %v155_v6 = vadd.s32 %v154_v1, %v149_v2  ;;  %s659_s11 = scalar_lea.sflag [#allocation6], %s1164_s27  ;;  %s1000_s12 = sshra.s32 %s675_s10, 4  ;;  %s1001_s12 = int_to_ptr.hbm [resolvable:$true] %s1000_s12 }
  0x34   : > { %v220_v33 = vadd.s32 88, %v1187_v21  ;;  %v219_v37 = vadd.s32 80, %v1187_v21  ;;  %v218_v42 = vadd.s32 72, %v1187_v21  ;;  %v217_v46 = vadd.s32 64, %v1187_v21  ;;  %s1002_s17 = scalar_lea.hbm %s1001_s12, 8  ;;  %s1006_s22 = scalar_lea.hbm %s1522_s2, 16 }
  0x35   : > { %v156_v7 = vadd.s32 %v154_v1, %v150_v3  ;;  %v157_v8 = vadd.s32 %v154_v1, %v151_v4  ;;  %v158_v9 = vadd.s32 %v154_v1, %v152_v5  ;;  %v159_v10 = vcvt.s32.f32 %v155_v6  ;;  %p1003_p6 = scmp.ne.s32.totalorder %s1001_s12, %s1002_s17  ;;  %p1007_p0 = scmp.lt.s32.totalorder %s1001_s12, %s1522_s2 }
  0x36   : > { %v195_v20 = vstv %s147_s4  ;;  %v216_v49 = vadd.s32 56, %v1187_v21  ;;  %v215_v50 = vadd.s32 48, %v1187_v21  ;;  %v214_v51 = vadd.s32 40, %v1187_v21  ;;  %p1008_p1 = scmp.lt.s32.totalorder %s1006_s22, %s1002_s17 }
  0x37   : > { %v160_v11 = vcvt.s32.f32 %v156_v7  ;;  %v161_v12 = vcvt.s32.f32 %v157_v8  ;;  %v162_v13 = vcvt.s32.f32 %v158_v9  ;;  %v1176_v14 = vmul.f32 1.378125, %v159_v10  ;;  %p1004_p9 = pnand %p1003_p6, %p1128_p11 }
  0x38   : > { %v213_v52 = vadd.s32 32, %v1187_v21  ;;  %v212_v53 = vadd.s32 24, %v1187_v21  ;;  %v211_v54 = vadd.s32 16, %v1187_v21  ;;  %v210_v55 = vadd.s32 8, %v1187_v21  ;;  %p1009_p3 = por %p1008_p1, %p1007_p0 }
  0x39   : > { %v1178_v15 = vmul.f32 1.378125, %v160_v11  ;;  %v1180_v16 = vmul.f32 1.378125, %v161_v12  ;;  %v1182_v17 = vmul.f32 1.378125, %v162_v13  ;;  %v875_v18 = vceil.f32 %v1176_v14  ;;  %p1005_p13 = pneg %p1004_p9 }
  0x3a   : > { %vm874_vm0 = vcmp.lt.s32.totalorder %v1176_v14, 0  ;;  %v876_v19 = vfloor.f32 %v1176_v14 }
  0x3b   : > { %vm879_vm1 = vcmp.lt.s32.totalorder %v1178_v15, 0  ;;  %v880_v22 = vceil.f32 %v1178_v15  ;;  %v881_v23 = vfloor.f32 %v1178_v15  ;;  %vm884_vm2 = vcmp.lt.s32.totalorder %v1180_v16, 0  ;;  %p1010_p4 = pnand %p1009_p3, %p1005_p13 }
  0x3c   : > { %v877_v24 = vsel %vm874_vm0, %v875_v18, %v876_v19  ;;  %v885_v25 = vceil.f32 %v1180_v16  ;;  %v886_v26 = vfloor.f32 %v1180_v16  ;;  %vm889_vm3 = vcmp.lt.s32.totalorder %v1182_v17, 0 }
  0x3d   : > { %v1196_v27 = vcvt.f32.s32 %v877_v24  ;;  %v882_v28 = vsel %vm879_vm1, %v880_v22, %v881_v23  ;;  %v890_v29 = vceil.f32 %v1182_v17  ;;  %v891_v30 = vfloor.f32 %v1182_v17 }
  0x3e   : > { %v1200_v31 = vcvt.f32.s32 %v882_v28  ;;  %v887_v32 = vsel %vm884_vm2, %v885_v25, %v886_v26 }
  0x3f   : > { %v1203_v34 = vcvt.f32.s32 %v887_v32  ;;  %v892_v35 = vsel %vm889_vm3, %v890_v29, %v891_v30  ;;  %v1206_v36 = vsub.s32 %v1196_v27, %v195_v20  ;;  %v171_v56 = vcvt.s32.f32 %v1196_v27 }
  0x40   : > { %v1209_v38 = vcvt.f32.s32 %v892_v35  ;;  %v1212_v39 = vsub.s32 %v1200_v31, %v195_v20  ;;  %v172_v11 = vcvt.s32.f32 %v1200_v31 }
  0x41   : > { %v1215_v40 = vsub.s32 %v1203_v34, %v195_v20  ;;  %v1218_v41 = vshra.s32 %v1206_v36, 3  ;;  %v175_v58 = vsub.f32 %v1176_v14, %v171_v56  ;;  %v204_v1 = vand.u32 7, %v1206_v36 }
  0x42   : > { %v1222_v43 = vsub.s32 %v1209_v38, %v195_v20  ;;  %v1225_v44 = vshra.s32 %v1212_v39, 3  ;;  %v205_v5 = vand.u32 7, %v1212_v39  ;;  %v173_v18 = vcvt.s32.f32 %v1203_v34 }
  0x43   : > { %v1228_v45 = vshra.s32 %v1215_v40, 3  ;;  %vm265_vm4 = vcmp.eq.s32.totalorder %v220_v33, %v1218_v41  ;;  %vm261_vm5 = vcmp.eq.s32.totalorder %v219_v37, %v1218_v41  ;;  %vm257_vm9 = vcmp.eq.s32.totalorder %v218_v42, %v1218_v41 }
  0x44   : > { %v1234_v47 = vshra.s32 %v1222_v43, 3  ;;  %803 = vmatpush.msk.msra.mxu0 %vm265_vm4, %v1059_v48  ;;  %vm266_vm6 = vcmp.eq.s32.totalorder %v220_v33, %v1225_v44  ;;  %vm262_vm7 = vcmp.eq.s32.totalorder %v219_v37, %v1225_v44  ;;  %vm258_vm13 = vcmp.eq.s32.totalorder %v218_v42, %v1225_v44 }
  0x45   : > { %819 = vmatpush.msk.msra.mxu1 %vm266_vm6, %v1059_v48  ;;  %vm267_vm8 = vcmp.eq.s32.totalorder %v220_v33, %v1228_v45  ;;  %vm263_vm10 = vcmp.eq.s32.totalorder %v219_v37, %v1228_v45  ;;  %vm253_vm14 = vcmp.eq.s32.totalorder %v217_v46, %v1218_v41  ;;  %vm259_vm15 = vcmp.eq.s32.totalorder %v218_v42, %v1228_v45 }
  0x46   : > { %804 = vmatpush.msk.msra.mxu0 %vm261_vm5, %v1059_v48  ;;  %835 = vmatpush.msk.msra.mxu2 %vm267_vm8, %v1059_v48  ;;  %vm268_vm11 = vcmp.eq.s32.totalorder %v220_v33, %v1234_v47  ;;  %vm264_vm12 = vcmp.eq.s32.totalorder %v219_v37, %v1234_v47  ;;  %vm260_vm0 = vcmp.eq.s32.totalorder %v218_v42, %v1234_v47  ;;  %v183_v59 = vsub.f32 1.0, %v175_v58 }
  0x47   : > { %851 = vmatpush.msk.msra.mxu3 %vm268_vm11, %v1059_v48  ;;  %820 = vmatpush.msk.msra.mxu1 %vm262_vm7, %v1059_v48  ;;  %vm254_vm1 = vcmp.eq.s32.totalorder %v217_v46, %v1225_v44  ;;  %vm249_vm2 = vcmp.eq.s32.totalorder %v216_v49, %v1218_v41  ;;  %vm255_vm3 = vcmp.eq.s32.totalorder %v217_v46, %v1228_v45  ;;  %v206_v25 = vand.u32 7, %v1215_v40 }
  0x48   : > { %805 = vmatpush.msk.msra.mxu0 %vm257_vm9, %v1059_v48  ;;  %836 = vmatpush.msk.msra.mxu2 %vm263_vm10, %v1059_v48  ;;  %vm256_vm4 = vcmp.eq.s32.totalorder %v217_v46, %v1234_v47  ;;  %vm250_vm5 = vcmp.eq.s32.totalorder %v216_v49, %v1225_v44  ;;  %vm245_vm6 = vcmp.eq.s32.totalorder %v215_v50, %v1218_v41  ;;  %v207_v26 = vand.u32 7, %v1222_v43 }
  0x49   : > { %852 = vmatpush.msk.msra.mxu3 %vm264_vm12, %v1059_v48  ;;  %821 = vmatpush.msk.msra.mxu1 %vm258_vm13, %v1059_v48  ;;  %vm251_vm7 = vcmp.eq.s32.totalorder %v216_v49, %v1228_v45  ;;  %vm252_vm8 = vcmp.eq.s32.totalorder %v216_v49, %v1234_v47  ;;  %vm246_vm9 = vcmp.eq.s32.totalorder %v215_v50, %v1225_v44  ;;  %v174_v30 = vcvt.s32.f32 %v1209_v38 }
  0x4a   : > { %806 = vmatpush.msk.msra.mxu0 %vm253_vm14, %v1059_v48  ;;  %837 = vmatpush.msk.msra.mxu2 %vm259_vm15, %v1059_v48  ;;  %vm241_vm10 = vcmp.eq.s32.totalorder %v214_v51, %v1218_v41  ;;  %vm247_vm11 = vcmp.eq.s32.totalorder %v215_v50, %v1228_v45  ;;  %vm248_vm12 = vcmp.eq.s32.totalorder %v215_v50, %v1234_v47 }
  0x4b   : > { %853 = vmatpush.msk.msra.mxu3 %vm260_vm0, %v1059_v48  ;;  %822 = vmatpush.msk.msra.mxu1 %vm254_vm1, %v1059_v48  ;;  %vm242_vm13 = vcmp.eq.s32.totalorder %v214_v51, %v1225_v44  ;;  %vm237_vm14 = vcmp.eq.s32.totalorder %v213_v52, %v1218_v41  ;;  %vm243_vm15 = vcmp.eq.s32.totalorder %v214_v51, %v1228_v45 }
  0x4c   : > { %807 = vmatpush.msk.msra.mxu0 %vm249_vm2, %v1059_v48  ;;  %838 = vmatpush.msk.msra.mxu2 %vm255_vm3, %v1059_v48  ;;  %vm244_vm0 = vcmp.eq.s32.totalorder %v214_v51, %v1234_v47  ;;  %vm238_vm1 = vcmp.eq.s32.totalorder %v213_v52, %v1225_v44  ;;  %vm233_vm2 = vcmp.eq.s32.totalorder %v212_v53, %v1218_v41 }
  0x4d   : > { %854 = vmatpush.msk.msra.mxu3 %vm256_vm4, %v1059_v48  ;;  %823 = vmatpush.msk.msra.mxu1 %vm250_vm5, %v1059_v48  ;;  %vm239_vm3 = vcmp.eq.s32.totalorder %v213_v52, %v1228_v45  ;;  %vm240_vm4 = vcmp.eq.s32.totalorder %v213_v52, %v1234_v47  ;;  %vm234_vm5 = vcmp.eq.s32.totalorder %v212_v53, %v1225_v44 }
  0x4e   : > { %808 = vmatpush.msk.msra.mxu0 %vm245_vm6, %v1059_v48  ;;  %839 = vmatpush.msk.msra.mxu2 %vm251_vm7, %v1059_v48  ;;  %vm229_vm6 = vcmp.eq.s32.totalorder %v211_v54, %v1218_v41  ;;  %vm235_vm7 = vcmp.eq.s32.totalorder %v212_v53, %v1228_v45  ;;  %v176_v28 = vsub.f32 %v1178_v15, %v172_v11 }
  0x4f   : > { %855 = vmatpush.msk.msra.mxu3 %vm252_vm8, %v1059_v48  ;;  %824 = vmatpush.msk.msra.mxu1 %vm246_vm9, %v1059_v48  ;;  %vm236_vm8 = vcmp.eq.s32.totalorder %v212_v53, %v1234_v47  ;;  %vm230_vm9 = vcmp.eq.s32.totalorder %v211_v54, %v1225_v44  ;;  %v177_v35 = vsub.f32 %v1180_v16, %v173_v18 }
  0x50   : > { %809 = vmatpush.msk.msra.mxu0 %vm241_vm10, %v1059_v48  ;;  %840 = vmatpush.msk.msra.mxu2 %vm247_vm11, %v1059_v48  ;;  %vm225_vm10 = vcmp.eq.s32.totalorder %v210_v55, %v1218_v41  ;;  %vm231_vm11 = vcmp.eq.s32.totalorder %v211_v54, %v1228_v45  ;;  %v184_v15 = vsub.f32 1.0, %v176_v28  ;;  %v1409_v42 = vsub.f32 %v1182_v17, %v174_v30 }
  0x51   : > { %856 = vmatpush.msk.msra.mxu3 %vm248_vm12, %v1059_v48  ;;  %825 = vmatpush.msk.msra.mxu1 %vm242_vm13, %v1059_v48  ;;  %vm232_vm12 = vcmp.eq.s32.totalorder %v211_v54, %v1234_v47  ;;  %vm226_vm13 = vcmp.eq.s32.totalorder %v210_v55, %v1225_v44 }
  0x52   : > { %810 = vmatpush.msk.msra.mxu0 %vm237_vm14, %v1059_v48  ;;  %841 = vmatpush.msk.msra.mxu2 %vm243_vm15, %v1059_v48  ;;  %vm221_vm14 = vcmp.eq.s32.totalorder %v1187_v21, %v1218_v41  ;;  %vm227_vm15 = vcmp.eq.s32.totalorder %v210_v55, %v1228_v45  ;;  %v186_v56 = vsub.f32 1.0, %v1409_v42 }
  0x53   : > { %857 = vmatpush.msk.msra.mxu3 %vm244_vm0, %v1059_v48  ;;  %826 = vmatpush.msk.msra.mxu1 %vm238_vm1, %v1059_v48  ;;  %vm228_vm0 = vcmp.eq.s32.totalorder %v210_v55, %v1234_v47  ;;  %vm369_vm1 = vcmask 785408  }
  0x54   : > { %811 = vmatpush.msk.msra.mxu0 %vm233_vm2, %v1059_v48  ;;  %842 = vmatpush.msk.msra.mxu2 %vm239_vm3, %v1059_v48  ;;  %vm222_vm2 = vcmp.eq.s32.totalorder %v1187_v21, %v1225_v44  ;;  %vm223_vm3 = vcmp.eq.s32.totalorder %v1187_v21, %v1228_v45  ;;  %v185_v44 = vsub.f32 1.0, %v177_v35 }
  0x55   : > { %858 = vmatpush.msk.msra.mxu3 %vm240_vm4, %v1059_v48  ;;  %827 = vmatpush.msk.msra.mxu1 %vm234_vm5, %v1059_v48  ;;  %vm179_vm4 = vcmp.ge.s32.totalorder %v1196_v27, 799  ;;  %vm224_vm5 = vcmp.eq.s32.totalorder %v1187_v21, %v1234_v47 }
  0x56   : > { %812 = vmatpush.msk.msra.mxu0 %vm229_vm6, %v1059_v48  ;;  %843 = vmatpush.msk.msra.mxu2 %vm235_vm7, %v1059_v48  ;;  %v1347_v60 = vsel %vm179_vm4, 1.0, %v183_v59  ;;  %v1370_v0 = vsel %vm179_vm4, 0.0, %v175_v58  ;;  %vm1374_vm6 = vcmp.eq.s32.totalorder %v1187_v21, %v204_v1  ;;  %vm1382_vm7 = vcmp.eq.s32.totalorder %v1187_v21, %v205_v5 }
  0x57   : > { %859 = vmatpush.msk.msra.mxu3 %vm236_vm8, %v1059_v48  ;;  %828 = vmatpush.msk.msra.mxu1 %vm230_vm9, %v1059_v48  ;;  %vm1399_vm8 = vcmp.eq.s32.totalorder %v1187_v21, %v206_v25  ;;  %vm1404_vm9 = vcmp.eq.s32.totalorder %v1187_v21, %v207_v26 }
  0x58   : > { %813 = vmatpush.msk.msra.mxu0 %vm225_vm10, %v1059_v48  ;;  %844 = vmatpush.msk.msra.mxu2 %vm231_vm11, %v1059_v48  ;;  %vm180_vm10 = vcmp.ge.s32.totalorder %v1200_v31, 799  ;;  %vm181_vm11 = vcmp.ge.s32.totalorder %v1203_v34, 799 }
  0x59   : > { %860 = vmatpush.msk.msra.mxu3 %vm232_vm12, %v1059_v48  ;;  %829 = vmatpush.msk.msra.mxu1 %vm226_vm13, %v1059_v48  ;;  %v1425_v54 = vsel %vm180_vm10, 1.0, %v184_v15  ;;  %vm182_vm12 = vcmp.ge.s32.totalorder %v1209_v38, 799  ;;  %v1440_v5 = vsel %vm180_vm10, 0.0, %v176_v28  ;;  %v1446_v18 = vsel %vm181_vm11, 0.0, %v177_v35 }
  0x5a   : > { %814 = vmatpush.msk.msra.mxu0 %vm221_vm14, %v1059_v48  ;;  %845 = vmatpush.msk.msra.mxu2 %vm227_vm15, %v1059_v48  ;;  %vm638_vm13 = vcmask 1040384   ;;  %vm650_vm14 = vcmask 1041408   ;;  %vm652_vm15 = vcmask 1045508  }
  0x5b   : > { %861 = vmatpush.msk.msra.mxu3 %vm228_vm0, %v1059_v48  ;;  %815 = vmatmul.msk.f32.vlgmr.msra.gmra.mxu0 %vm369_vm1, %v365_v57  ;;  %vm654_vm0 = vcmask 1043456  }
  0x5c   : > { %830 = vmatpush.msk.msra.mxu1 %vm222_vm2, %v1059_v48  ;;  %846 = vmatpush.msk.msra.mxu2 %vm223_vm3, %v1059_v48 }
  0x5d   : > { %862 = vmatpush.msk.msra.mxu3 %vm224_vm5, %v1059_v48  ;;  %831 = vmatmul.msk.f32.vlgmr.msra.gmra.mxu1 %vm369_vm1, %v365_v57 }
  0x5e   : > { %847 = vmatmul.msk.f32.vlgmr.msra.gmra.mxu2 %vm369_vm1, %v365_v57  ;;  %863 = vmatmul.msk.f32.vlgmr.msra.gmra.mxu3 %vm369_vm1, %v365_v57 }
  0x63   : > { %816 = vmatmul.msk.f32.gmra.mxu0 %vm369_vm1, %v366_v61 }
  0x65   : > { %832 = vmatmul.msk.f32.gmra.mxu1 %vm369_vm1, %v366_v61 }
  0x66   : > { %848 = vmatmul.msk.f32.gmra.mxu2 %vm369_vm1, %v366_v61  ;;  %864 = vmatmul.msk.f32.gmra.mxu3 %vm369_vm1, %v366_v61 }
  0x6b   : > { %817 = vmatmul.msk.f32.gmra.mxu0 %vm369_vm1, %v367_v62 }
  0x6d   : > { %833 = vmatmul.msk.f32.gmra.mxu1 %vm369_vm1, %v367_v62 }
  0x6e   : > { %849 = vmatmul.msk.f32.gmra.mxu2 %vm369_vm1, %v367_v62  ;;  %865 = vmatmul.msk.f32.gmra.mxu3 %vm369_vm1, %v367_v62  ;;  %v1433_v62 = vsel %vm181_vm11, 1.0, %v185_v44 }
  0x73   : > { %818 = vmatmul.msk.f32.gmra.mxu0 %vm369_vm1, %v368_v63 }
  0x75   : > { %834 = vmatmul.msk.f32.gmra.mxu1 %vm369_vm1, %v368_v63 }
  0x76   : > { %850 = vmatmul.msk.f32.gmra.mxu2 %vm369_vm1, %v368_v63  ;;  %866 = vmatmul.msk.f32.gmra.mxu3 %vm369_vm1, %v368_v63 }
  0xd8   : > { %v399_v3 = vpop.f32.mrf.mxu0 }
  0xd9   : > { %v502_v4 = vsel %vm1374_vm6, %v399_v3, 0.0 }
  0xda   : > { %v506_v6 = vrot.slane %v502_v4, 4  ;;  %v428_v7 = vpop.f32.mrf.mxu1 }
  0xdb   : > { %v503_v13 = vsel %vm1382_vm7, %v428_v7, 0.0 }
  0xdc   : > { %v507_v8 = vadd.f32 %v506_v6, %v502_v4  ;;  %v512_v29 = vrot.slane %v503_v13, 4 }
  0xde   : > { %v508_v10 = vrot.slane %v507_v8, 2  ;;  %v513_v41 = vadd.f32 %v512_v29, %v503_v13 }
  0xe0   : > { %v509_v12 = vadd.f32 %v508_v10, %v507_v8  ;;  %v402_v14 = vpop.f32.mrf.mxu0  ;;  %v514_v55 = vrot.slane %v513_v41, 2 }
  0xe1   : > { %v530_v19 = vsel %vm1374_vm6, %v402_v14, 0.0  ;;  %v457_v20 = vpop.f32.mrf.mxu2  ;;  %v486_v22 = vpop.f32.mrf.mxu3 }
  0xe2   : > { %v510_v23 = vrot.slane %v509_v12, 1  ;;  %v534_v24 = vrot.slane %v530_v19, 4  ;;  %v431_v27 = vpop.f32.mrf.mxu1  ;;  %v504_v21 = vsel %vm1399_vm8, %v457_v20, 0.0  ;;  %v505_v46 = vsel %vm1404_vm9, %v486_v22, 0.0 }
  0xe3   : > { %v531_v16 = vsel %vm1382_vm7, %v431_v27, 0.0  ;;  %v518_v63 = vrot.slane %v504_v21, 4  ;;  %v524_v1 = vrot.slane %v505_v46, 4  ;;  %v515_v8 = vadd.f32 %v514_v55, %v513_v41 }
  0xe4   : > { %v511_v32 = vadd.f32 %v510_v23, %v509_v12  ;;  %v535_v33 = vadd.f32 %v534_v24, %v530_v19  ;;  %v540_v50 = vrot.slane %v531_v16, 4  ;;  %v1451_v19 = vsel %vm182_vm12, 0.0, %v1409_v42 }
  0xe5   : > { %v519_v20 = vadd.f32 %v518_v63, %v504_v21  ;;  %v525_v22 = vadd.f32 %v524_v1, %v505_v46  ;;  %v516_v30 = vrot.slane %v515_v8, 1 }
  0xe6   : > { %v558_v36 = vmul.f32 %v511_v32, %v1347_v60  ;;  %v536_v37 = vrot.slane %v535_v33, 2  ;;  %v541_v6 = vadd.f32 %v540_v50, %v531_v16 }
  0xe7   : > { %v520_v16 = vrot.slane %v519_v20, 2 }
  0xe8   : > { %v537_v43 = vadd.f32 %v536_v37, %v535_v33  ;;  %v405_v45 = vpop.f32.mrf.mxu0  ;;  %v542_v27 = vrot.slane %v541_v6, 2 }
  0xe9   : > { %v570_v17 = vsel %vm1374_vm6, %v405_v45, 0.0  ;;  %v460_v47 = vpop.f32.mrf.mxu2  ;;  %v489_v48 = vpop.f32.mrf.mxu3 }
  0xea   : > { %v538_v49 = vrot.slane %v537_v43, 1  ;;  %v574_v51 = vrot.slane %v570_v17, 4  ;;  %v532_v52 = vsel %vm1399_vm8, %v460_v47, 0.0  ;;  %v434_v53 = vpop.f32.mrf.mxu1  ;;  %v533_v61 = vsel %vm1404_vm9, %v489_v48, 0.0 }
  0xeb   : > { %v546_v57 = vrot.slane %v532_v52, 4  ;;  %v571_v3 = vsel %vm1382_vm7, %v434_v53, 0.0  ;;  %v552_v11 = vrot.slane %v533_v61, 4  ;;  %v543_v21 = vadd.f32 %v542_v27, %v541_v6 }
  0xec   : > { %v539_v58 = vadd.f32 %v538_v49, %v537_v43  ;;  %v575_v59 = vadd.f32 %v574_v51, %v570_v17  ;;  %v580_v12 = vrot.slane %v571_v3, 4  ;;  %v526_v43 = vrot.slane %v525_v22, 2 }
  0xed   : > { %v547_v10 = vadd.f32 %v546_v57, %v532_v52  ;;  %v553_v33 = vadd.f32 %v552_v11, %v533_v61  ;;  %v517_v57 = vadd.f32 %v516_v30, %v515_v8 }
  0xee   : > { %v562_v4 = vmul.f32 %v539_v58, %v1370_v0  ;;  %v576_v7 = vrot.slane %v575_v59, 2  ;;  %v581_v23 = vadd.f32 %v580_v12, %v571_v3  ;;  %v521_v58 = vadd.f32 %v520_v16, %v519_v20 }
  0xef   : > { %v548_v32 = vrot.slane %v547_v10, 2  ;;  %v554_v49 = vrot.slane %v553_v33, 2  ;;  %v544_v3 = vrot.slane %v543_v21, 1  ;;  %v559_v40 = vmul.f32 %v517_v57, %v1425_v54 }
  0xf0   : > { %v1442_v13 = vadd.f32 %v562_v4, %v558_v36  ;;  %v577_v14 = vadd.f32 %v576_v7, %v575_v59  ;;  %v408_v31 = vpop.f32.mrf.mxu0  ;;  %v582_v15 = vrot.slane %v581_v23, 2  ;;  %v527_v59 = vadd.f32 %v526_v43, %v525_v22 }
  0xf1   : > { %v598_v24 = vsel %vm1374_vm6, %v408_v31, 0.0  ;;  %v463_v25 = vpop.f32.mrf.mxu2  ;;  %v492_v26 = vpop.f32.mrf.mxu3  ;;  %v549_v48 = vadd.f32 %v548_v32, %v547_v10  ;;  %v555_v7 = vadd.f32 %v554_v49, %v553_v33  ;;  %v522_v20 = vrot.slane %v521_v58, 1 }
  0xf2   : > { %v578_v28 = vrot.slane %v577_v14, 1  ;;  %v602_v29 = vrot.slane %v598_v24, 4  ;;  %v572_v34 = vsel %vm1399_vm8, %v463_v25, 0.0  ;;  %v437_v36 = vpop.f32.mrf.mxu1  ;;  %v573_v2 = vsel %vm1404_vm9, %v492_v26, 0.0 }
  0xf3   : > { %v586_v35 = vrot.slane %v572_v34, 4  ;;  %v592_v45 = vrot.slane %v573_v2, 4  ;;  %v599_v47 = vsel %vm1382_vm7, %v437_v36, 0.0  ;;  %v583_v52 = vadd.f32 %v582_v15, %v581_v23 }
  0xf4   : > { %v579_v37 = vadd.f32 %v578_v28, %v577_v14  ;;  %v603_v41 = vadd.f32 %v602_v29, %v598_v24  ;;  %v608_v55 = vrot.slane %v599_v47, 4  ;;  %v550_v6 = vrot.slane %v549_v48, 1 }
  0xf5   : > { %v587_v44 = vadd.f32 %v586_v35, %v572_v34  ;;  %v593_v51 = vadd.f32 %v592_v45, %v573_v2  ;;  %v584_v12 = vrot.slane %v583_v52, 1  ;;  %v528_v25 = vrot.slane %v527_v59, 1 }
  0xf6   : > { %v626_v46 = vmul.f32 %v579_v37, %v1347_v60  ;;  %v604_v17 = vrot.slane %v603_v41, 2  ;;  %v609_v4 = vadd.f32 %v608_v55, %v599_v47  ;;  %v545_v26 = vadd.f32 %v544_v3, %v543_v21 }
  0xf7   : > { %v588_v50 = vrot.slane %v587_v44, 2  ;;  %v594_v61 = vrot.slane %v593_v51, 2  ;;  %v556_v28 = vrot.slane %v555_v7, 1  ;;  %v551_v32 = vadd.f32 %v550_v6, %v549_v48 }
  0xf8   : > { %v605_v53 = vadd.f32 %v604_v17, %v603_v41  ;;  %v610_v31 = vrot.slane %v609_v4, 2  ;;  %v585_v33 = vadd.f32 %v584_v12, %v583_v52  ;;  %v523_v2 = vadd.f32 %v522_v20, %v521_v58 }
  0xf9   : > { %v466_v63 = vpop.f32.mrf.mxu2  ;;  %v495_v1 = vpop.f32.mrf.mxu3  ;;  %v589_v10 = vadd.f32 %v588_v50, %v587_v44  ;;  %v595_v22 = vadd.f32 %v594_v61, %v593_v51  ;;  %v563_v16 = vmul.f32 %v545_v26, %v1440_v5  ;;  %v557_v44 = vadd.f32 %v556_v28, %v555_v7 }
  0xfa   : > { %v606_v60 = vrot.slane %v605_v53, 1  ;;  %v600_v9 = vsel %vm1399_vm8, %v466_v63, 0.0  ;;  %v601_v8 = vsel %vm1404_vm9, %v495_v1, 0.0  ;;  %v611_v39 = vadd.f32 %v610_v31, %v609_v4 }
  0xfb   : > { %v614_v11 = vrot.slane %v600_v9, 4  ;;  %v620_v24 = vrot.slane %v601_v8, 4  ;;  %v590_v29 = vrot.slane %v589_v10, 1  ;;  %v596_v37 = vrot.slane %v595_v22, 1 }
  0xfc   : > { %v607_v14 = vadd.f32 %v606_v60, %v605_v53  ;;  %v612_v36 = vrot.slane %v611_v39, 1  ;;  %v529_v47 = vadd.f32 %v528_v25, %v527_v59  ;;  %v627_v48 = vmul.f32 %v585_v33, %v1425_v54 }
  0xfd   : > { %v615_v23 = vadd.f32 %v614_v11, %v600_v9  ;;  %v621_v30 = vadd.f32 %v620_v24, %v601_v8  ;;  %v591_v45 = vadd.f32 %v590_v29, %v589_v10  ;;  %v190_v50 = vsel %vm182_vm12, 1.0, %v186_v56 }
  0xfe   : > { %v630_v27 = vmul.f32 %v607_v14, %v1370_v0  ;;  %v613_v43 = vadd.f32 %v612_v36, %v611_v39  ;;  %v597_v51 = vadd.f32 %v596_v37, %v595_v22  ;;  %v560_v53 = vmul.f32 %v523_v2, %v1433_v62 }
  0xff   : > { %v616_v34 = vrot.slane %v615_v23, 2  ;;  %v622_v41 = vrot.slane %v621_v30, 2  ;;  %v567_v55 = vadd.f32 %v563_v16, %v559_v40  ;;  %v565_v58 = vmul.f32 %v557_v44, %v1451_v19 }
 0x100   : > { %v634_v35 = vadd.f32 %v630_v27, %v626_v46  ;;  %v564_v46 = vmul.f32 %v551_v32, %v1446_v18  ;;  %v631_v49 = vmul.f32 %v613_v43, %v1440_v5  ;;  %v628_v59 = vmul.f32 %v591_v45, %v1433_v62 }
 0x101   : > { %v617_v15 = vadd.f32 %v616_v34, %v615_v23  ;;  %v623_v17 = vadd.f32 %v622_v41, %v621_v30  ;;  %v561_v42 = vmul.f32 %v529_v47, %v190_v50  ;;  %v629_v38 = vmul.f32 %v597_v51, %v190_v50 }
 0x102   : > { %v639_v0 = vsel %vm638_vm13, %v1442_v13, %v634_v35  ;;  %v635_v57 = vadd.f32 %v631_v49, %v627_v48  ;;  %v568_v5 = vadd.f32 %v564_v46, %v560_v53 }
 0x103   : > { %v618_v21 = vrot.slane %v617_v15, 1  ;;  %v624_v52 = vrot.slane %v623_v17, 1  ;;  %v569_v3 = vadd.f32 %v565_v58, %v561_v42 }
 0x104   : > { %v640_v56 = vsel %vm638_vm13, %v567_v55, %v635_v57 }
 0x105   : > { %v619_v13 = vadd.f32 %v618_v21, %v617_v15  ;;  %v625_v61 = vadd.f32 %v624_v52, %v623_v17 }
 0x107   : > { %v632_v54 = vmul.f32 %v619_v13, %v1446_v18  ;;  %v633_v1 = vmul.f32 %v625_v61, %v1451_v19  ;;  %v647_v18 = vrot.slane %v640_v56, 6 }
 0x109   : > { %v636_v63 = vadd.f32 %v632_v54, %v628_v59  ;;  %v637_v60 = vadd.f32 %v633_v1, %v629_v38  ;;  %v651_v6 = vsel %vm650_vm14, %v639_v0, %v647_v18 }
 0x10b   : > { %v641_v62 = vsel %vm638_vm13, %v568_v5, %v636_v63  ;;  %v642_v9 = vsel %vm638_vm13, %v569_v3, %v637_v60 }
 0x10c   : > { %v648_v4 = vrot.slane %v641_v62, 4  ;;  %v649_v19 = vrot.slane %v642_v9, 2 }
 0x10e   : > { %v653_v7 = vsel %vm652_vm15, %v648_v4, %v649_v19 }
 0x10f   : > { %v655_v10 = vsel %vm654_vm0, %v651_v6, %v653_v7 }
 0x110   : > { %657 = vst [vmem:[%s145_s0] sm:$0xff] %v655_v10 }
 0x111   : > { %1013 = shalt.err (!%p1010_p4)
}
 0x112   : > { %896 = dma.vmem_to_hbm [thread:$0]  (%p1128_p11), %s673_s9, 128, %s675_s10, %s659_s11  }
 0x113 PF: > { %s686_s27 = sand.u32 1, %s1042_s13   ;;  %p1536_p7 = scmp.ge.s32.totalorder %s1054_s16, 2 }
 0x114   : > { %s687_s29 = scalar_lea.sflag [#allocation6], %s686_s27 }
 0x115   : > { %p903_p5 = pnand %p1536_p7, %p1132_p12 }
 0x117   : > { %p904_p8 = pneg %p903_p5 }
 0x119   : > { %1037 = dma.done.wait (%p904_p8), %s687_s29, 128  }
 0x11a   : > { %1039 = vsyncadd (%p904_p8), %s687_s29, 4294967168  ;;  %p23_p10 = scmp.ge.s32.totalorder %s1103_s18, 4   ;;  %s1537_s13 = smov %s1046_s14 }
 0x11b   : > { %s1538_s14 = smov %s1050_s15  ;;  %s1539_s15 = smov %s1115_s21 }
 0x11c   : > { %s1540_s16 = smov %s1103_s18  ;;  %25 = sbr.rel (!%p23_p10) target bundleno = 11 (0xb), region = 69 }
 0x121   :  { %693 = vsyncpa [#allocation5], 1 }
 0x122   :  { %695 = vsyncpa [#allocation5 + $0x1], 1 }
 0x123   :  { %696 = vsyncpa [#allocation6], 1 }
 0x124   :  { %698 = vsyncpa [#allocation6 + $0x1], 1 }

</bundles_post_ra>
